<compile_context>
chip_gen: v5e
topology: v5e:2x2
jax: 0.10.0
libtpu: 0.0.40
codegen_flags: <defaults>
</compile_context>

<pallas_src>
import jax
import jax.numpy as jnp
import numpy as np
from jax.experimental import pallas as pl
from jax.experimental.pallas import tpu as pltpu


_HALO = 9          # 3 fused blocks x 3-pixel conv padding
_EPS = 1e-6
_VMEM_LIMIT = 64 * 1024 * 1024   # explicit scoped-VMEM budget (fits v7x physical)


def _choose_row_tile(H):
    """Largest preferred row tile dividing H (halo handling needs TH >= 9)."""
    for th in (16, 32):
        if H > th and H % th == 0:
            return th
    return H


def _choose_m_tile(M, pref=1024):
    if M <= pref:
        return M
    for tm in (1024, 512, 256, 128, 64, 32, 16, 8):
        if M % tm == 0:
            return tm
    return M


# ---------------------------------------------------------------------------
# Kernel A: 1x1 conv (nin_shortcut) == row-tiled channel matmul on the MXU.
# ---------------------------------------------------------------------------
def _pointwise_conv_kernel(x_ref, w_ref, b_ref, o_ref):
    o_ref[...] = (
        jnp.dot(x_ref[...], w_ref[...], preferred_element_type=jnp.float32)
        + b_ref[...]
    ).astype(o_ref.dtype)


def pointwise_conv(x_nhwc, w, b):
    N, H, W, Cin = x_nhwc.shape
    Cout = w.shape[1]
    M = N * H * W
    tm = _choose_m_tile(M)
    xf = x_nhwc.reshape(M, Cin)
    out = pl.pallas_call(
        _pointwise_conv_kernel,
        out_shape=jax.ShapeDtypeStruct((M, Cout), x_nhwc.dtype),
        grid_spec=pltpu.PrefetchScalarGridSpec(
            num_scalar_prefetch=0,
            grid=(M // tm,),
            in_specs=[
                pl.BlockSpec((tm, Cin), lambda i: (i, 0)),
                pl.BlockSpec((Cin, Cout), lambda i: (0, 0)),
                pl.BlockSpec((1, Cout), lambda i: (0, 0)),
            ],
            out_specs=pl.BlockSpec((tm, Cout), lambda i: (i, 0)),
        ),
        compiler_params=pltpu.CompilerParams(
            dimension_semantics=("parallel",),
            vmem_limit_bytes=_VMEM_LIMIT,
        ),
    )(xf, w, b.reshape(1, Cout))
    return out.reshape(N, H, W, Cout)


# ---------------------------------------------------------------------------
# Kernel B: the three ConvNeXt blocks fused, gridded over (batch, row-tiles).
# ---------------------------------------------------------------------------
def convnext3_fused(x_nhwc, stacked):
    """Run block1,block2,block3 back-to-back per (n, row-tile) grid step.

    Each step produces one TH-row output tile; the 9-row halo is assembled in a
    zero-padded VMEM scratch window from the prev/cur/next row tiles, and each
    intermediate stage's out-of-image rows are re-zeroed so the next stage sees
    correct conv zero-padding at the image edges.
    """
    N, H, W, C = x_nhwc.shape
    C4 = stacked["w1"].shape[-1]
    TH = _choose_row_tile(H)
    T = H // TH
    has_halo = T > 1

    w_names = ("dw_w", "dw_b", "ln_g", "ln_b", "w1", "b1", "w2", "b2", "ls")
    w_arrays = [stacked[k] for k in w_names]

    def kernel(*args):
        nx = 3 if has_halo else 1
        if has_halo:
            xm1_ref, x0_ref, xp1_ref = args[:3]
        else:
            (x0_ref,) = args[:1]
        (dww_ref, dwb_ref, lng_ref, lnb_ref,
         w1_ref, fb1_ref, w2_ref, fb2_ref, ls_ref) = args[nx:nx + 9]
        o_ref = args[nx + 9]
        pad0, pad1, pad2 = args[nx + 10:nx + 13]

        t = pl.program_id(1)
        f32 = jnp.float32

        def run_block(xin, b):
            """One ConvNeXt block on a zero-padded (rows+6, W+6, C) window."""
            r = xin.shape[0] - 6
            dww = dww_ref[b]                                   # (7, 7, C)
            # 7 column-shifted slabs loaded once, reused across the 7 row taps
            cols = [xin[:, dx:dx + W, :] for dx in range(7)]
            inp = cols[3][3:3 + r]                             # residual branch
            acc = jnp.zeros((r, W, C), f32)
            for dy in range(7):
                for dx in range(7):
                    acc = acc + cols[dx][dy:dy + r] * dww[dy, dx][None, None, :]
            acc = acc + dwb_ref[b].reshape(1, 1, C)
            # LayerNorm over channels (one-pass statistics, eps = 1e-6)
            mean = jnp.mean(acc, axis=-1, keepdims=True)
            var = jnp.mean(acc * acc, axis=-1, keepdims=True) - mean * mean
            y = (acc - mean) * jax.lax.rsqrt(var + _EPS)
            y = y * lng_ref[b].reshape(1, 1, C) + lnb_ref[b].reshape(1, 1, C)
            # pointwise MLP on the MXU: Linear(C->4C), exact-erf GELU, Linear(4C->C)
            y2 = y.reshape(r * W, C)
            h = jnp.dot(y2, w1_ref[b], preferred_element_type=f32) + fb1_ref[b].reshape(1, C4)
            h = jax.nn.gelu(h, approximate=False)              # nn.GELU default (erf)
            o = jnp.dot(h, w2_ref[b], preferred_element_type=f32) + fb2_ref[b].reshape(1, C)
            o = o.reshape(r, W, C) * ls_ref[b].reshape(1, 1, C)
            return inp + o

        # ---- assemble zero-padded input window: rows [r0-9, r0+TH+9), cols [-3, W+3) ----
        pad0[...] = jnp.zeros_like(pad0)
        pad0[_HALO:_HALO + TH, 3:3 + W, :] = x0_ref[...].astype(f32)
        if has_halo:
            @pl.when(t > 0)
            def _():
                pad0[0:_HALO, 3:3 + W, :] = xm1_ref[TH - _HALO:TH, :, :].astype(f32)

            @pl.when(t < T - 1)
            def _():
                pad0[_HALO + TH:2 * _HALO + TH, 3:3 + W, :] = xp1_ref[0:_HALO, :, :].astype(f32)

        # ---- block 1: output rows [r0-6, r0+TH+6); zero rows outside the image ----
        s1 = run_block(pad0[...], 0)                           # (TH+12, W, C)
        pad1[...] = jnp.zeros_like(pad1)
        pad1[:, 3:3 + W, :] = s1

        @pl.when(t == 0)
        def _():
            pad1[0:6, :, :] = jnp.zeros((6, W + 6, C), f32)

        @pl.when(t == T - 1)
        def _():
            pad1[TH + 6:TH + 12, :, :] = jnp.zeros((6, W + 6, C), f32)

        # ---- block 2: output rows [r0-3, r0+TH+3) ----
        s2 = run_block(pad1[...], 1)                           # (TH+6, W, C)
        pad2[...] = jnp.zeros_like(pad2)
        pad2[:, 3:3 + W, :] = s2

        @pl.when(t == 0)
        def _():
            pad2[0:3, :, :] = jnp.zeros((3, W + 6, C), f32)

        @pl.when(t == T - 1)
        def _():
            pad2[TH + 3:TH + 6, :, :] = jnp.zeros((3, W + 6, C), f32)

        # ---- block 3: output rows [r0, r0+TH) (all inside the image) ----
        o_ref[...] = run_block(pad2[...], 2).astype(o_ref.dtype)

    # --- specs ---
    if has_halo:
        x_specs = [
            pl.BlockSpec((None, TH, W, C), lambda n, t: (n, jnp.maximum(t - 1, 0), 0, 0)),
            pl.BlockSpec((None, TH, W, C), lambda n, t: (n, t, 0, 0)),
            pl.BlockSpec((None, TH, W, C), lambda n, t: (n, jnp.minimum(t + 1, T - 1), 0, 0)),
        ]
        x_args = (x_nhwc, x_nhwc, x_nhwc)
    else:
        x_specs = [pl.BlockSpec((None, TH, W, C), lambda n, t: (n, t, 0, 0))]
        x_args = (x_nhwc,)

    def _const_map(nd):
        def im(n, t):
            return (0,) * nd
        return im

    w_specs = [pl.BlockSpec(a.shape, _const_map(a.ndim)) for a in w_arrays]

    grid_spec = pltpu.PrefetchScalarGridSpec(
        num_scalar_prefetch=0,
        grid=(N, T),
        in_specs=list(x_specs) + w_specs,
        out_specs=pl.BlockSpec((None, TH, W, C), lambda n, t: (n, t, 0, 0)),
        scratch_shapes=[
            pltpu.VMEM((TH + 2 * _HALO, W + 6, C), jnp.float32),   # padded x window
            pltpu.VMEM((TH + 12, W + 6, C), jnp.float32),          # padded block-1 out
            pltpu.VMEM((TH + 6, W + 6, C), jnp.float32),           # padded block-2 out
        ],
    )
    return pl.pallas_call(
        kernel,
        out_shape=jax.ShapeDtypeStruct((N, H, W, C), x_nhwc.dtype),
        grid_spec=grid_spec,
        compiler_params=pltpu.CompilerParams(
            dimension_semantics=("parallel", "parallel"),
            vmem_limit_bytes=_VMEM_LIMIT,
        ),
    )(*x_args, *w_arrays)


# ---------------------------------------------------------------------------
# Module wrapper: nin_shortcut (when Cin != Cout) -> fused block1/2/3.
# ---------------------------------------------------------------------------
def my_convnext_block(x_nchw, params):
    x = jnp.transpose(x_nchw, (0, 2, 3, 1))                   # NCHW -> NHWC
    p1 = params["block1"]
    if p1.get("sc_w") is not None:                            # block1 nin_shortcut
        x = pointwise_conv(x, p1["sc_w"], p1["sc_b"])
    names = ("dw_w", "dw_b", "ln_g", "ln_b", "w1", "b1", "w2", "b2", "ls")
    stacked = {k: jnp.stack([params[blk][k] for blk in ("block1", "block2", "block3")])
               for k in names}
    x = convnext3_fused(x, stacked)
    return jnp.transpose(x, (0, 3, 1, 2))                     # NHWC -> NCHW


# ---------------------------------------------------------------------------
# Deterministic parameter init (shapes follow the module __init__; layer-scale
# gamma set larger than the 1e-6 init so the branch contributes in the test).
# ---------------------------------------------------------------------------
def _init_convnext_params(key, dim):
    ks = jax.random.split(key, 8)
    hid = 4 * dim
    return {
        "dw_w": jax.random.normal(ks[0], (7, 7, dim), jnp.float32) * 0.1,
        "dw_b": jax.random.normal(ks[1], (dim,), jnp.float32) * 0.1,
        "ln_g": 1.0 + jax.random.normal(ks[2], (dim,), jnp.float32) * 0.1,
        "ln_b": jax.random.normal(ks[3], (dim,), jnp.float32) * 0.1,
        "w1": jax.random.normal(ks[4], (dim, hid), jnp.float32) / np.sqrt(dim),
        "b1": jax.random.normal(ks[5], (hid,), jnp.float32) * 0.1,
        "w2": jax.random.normal(ks[6], (hid, dim), jnp.float32) / np.sqrt(hid),
        "b2": jax.random.normal(ks[7], (dim,), jnp.float32) * 0.1,
        "ls": jnp.full((dim,), 0.5, jnp.float32),
    }


def init_params(key, cin, cout):
    k1, k2, k3, ks = jax.random.split(key, 4)
    block1 = _init_convnext_params(k1, cout)
    if cin != cout:
        ka, kb = jax.random.split(ks)
        block1["sc_w"] = jax.random.normal(ka, (cin, cout), jnp.float32) / np.sqrt(cin)
        block1["sc_b"] = jax.random.normal(kb, (cout,), jnp.float32) * 0.1
    else:
        block1["sc_w"] = None
        block1["sc_b"] = None
    return {
        "block1": block1,
        "block2": _init_convnext_params(k2, cout),
        "block3": _init_convnext_params(k3, cout),
    }


# ---------------------------------------------------------------------------
# Pure-JAX reference (same math, NHWC) for a correctness check.
# ---------------------------------------------------------------------------
def _ref_block_one(x, p):
    inp = x
    N, H, W, C = x.shape
    xp = jnp.pad(x, ((0, 0), (3, 3), (3, 3), (0, 0)))
    acc = jnp.zeros_like(x)
    for dy in range(7):
        for dx in range(7):
            acc = acc + xp[:, dy:dy + H, dx:dx + W, :] * p["dw_w"][dy, dx]
    acc = acc + p["dw_b"]
    mean = acc.mean(-1, keepdims=True)
    var = ((acc - mean) ** 2).mean(-1, keepdims=True)
    y = (acc - mean) / jnp.sqrt(var + _EPS) * p["ln_g"] + p["ln_b"]
    h = jax.nn.gelu(y @ p["w1"] + p["b1"], approximate=False)
    o = (h @ p["w2"] + p["b2"]) * p["ls"]
    return inp + o


def ref_my_convnext_block(x_nchw, params):
    x = jnp.transpose(x_nchw, (0, 2, 3, 1))
    p1 = params["block1"]
    if p1.get("sc_w") is not None:
        x = jnp.einsum("nhwc,cd->nhwd", x, p1["sc_w"]) + p1["sc_b"]
    x = _ref_block_one(x, p1)
    x = _ref_block_one(x, params["block2"])
    x = _ref_block_one(x, params["block3"])
    return jnp.transpose(x, (0, 3, 1, 2))


if __name__ == "__main__":
    key = jax.random.PRNGKey(0)
    # Small but exercises the row-tile halo path (H=32 -> two 16-row tiles).
    N, Cin, Cout, H, W = 2, 4, 8, 32, 32
    k_x, k_p = jax.random.split(key)
    x = jax.random.normal(k_x, (N, Cin, H, W), jnp.float32)
    params = init_params(k_p, Cin, Cout)

    out = jax.block_until_ready(my_convnext_block(x, params))
    assert out.shape == (N, Cout, H, W)

    ref = jax.block_until_ready(ref_my_convnext_block(x, params))
    np.testing.assert_allclose(np.asarray(out), np.asarray(ref), rtol=1e-4, atol=2e-4)

    print("KERNEL_OK")
</pallas_src>

<mosaic_0001>
module attributes {stable_mosaic.version = 11 : i64} {
  func.func @_pointwise_conv_kernel(%arg0: i32, %arg1: memref<1024x4xf32, #tpu.memory_space<vmem>>, %arg2: memref<4x8xf32, #tpu.memory_space<vmem>>, %arg3: memref<1x8xf32, #tpu.memory_space<vmem>>, %arg4: memref<1024x8xf32, #tpu.memory_space<vmem>>) attributes {dimension_semantics = [#tpu.dimension_semantics<parallel>], iteration_bounds = array<i64: 2>, scalar_prefetch = 0 : i64, scratch_operands = 0 : i64, tpu.core_type = #tpu.core_type<tc>, window_params = [{transform_indices = @transform_0, window_bounds = array<i64: 1024, 4>}, {pipeline_mode = #tpu.pipeline_mode<synchronous>, transform_indices = @transform_1, window_bounds = array<i64: 4, 8>}, {pipeline_mode = #tpu.pipeline_mode<synchronous>, transform_indices = @transform_2, window_bounds = array<i64: 1, 8>}, {transform_indices = @transform_3, window_bounds = array<i64: 1024, 8>}]} {
    %c0 = arith.constant 0 : index
    %c0_0 = arith.constant 0 : index
    %0 = vector.load %arg1[%c0, %c0_0] : memref<1024x4xf32, #tpu.memory_space<vmem>>, vector<1024x4xf32>
    %c0_1 = arith.constant 0 : index
    %c0_2 = arith.constant 0 : index
    %1 = vector.load %arg2[%c0_1, %c0_2] : memref<4x8xf32, #tpu.memory_space<vmem>>, vector<4x8xf32>
    %cst = arith.constant dense<0.000000e+00> : vector<1024x8xf32>
    %2 = tpu.matmul %0, %1, %cst {dimension_numbers = #tpu.dot_dimension_numbers<[1], [0], [0], [1], [0, 0, 1, 1], [], []>} : vector<1024x4xf32>, vector<4x8xf32>, vector<1024x8xf32> -> vector<1024x8xf32>
    %c0_3 = arith.constant 0 : index
    %c0_4 = arith.constant 0 : index
    %3 = vector.load %arg3[%c0_3, %c0_4] : memref<1x8xf32, #tpu.memory_space<vmem>>, vector<1x8xf32>
    %4 = vector.broadcast %3 : vector<1x8xf32> to vector<1024x8xf32>
    %5 = arith.addf %2, %4 : vector<1024x8xf32>
    %c0_5 = arith.constant 0 : index
    %c0_6 = arith.constant 0 : index
    %6 = vector.load %arg4[%c0_5, %c0_6] : memref<1024x8xf32, #tpu.memory_space<vmem>>, vector<1024x8xf32>
    tpu.vector_store %arg4[%c0_5, %c0_6], %5 {strides = array<i32>} : memref<1024x8xf32, #tpu.memory_space<vmem>>, vector<1024x8xf32>,
    return
  }
  func.func @transform_0(%arg0: i32) -> (i32, i32) {
    %c0_i32 = arith.constant 0 : i32
    %c0_i32_0 = arith.constant 0 : i32
    return %arg0, %c0_i32 : i32, i32
  }
  func.func @transform_1(%arg0: i32) -> (i32, i32) {
    %c0_i32 = arith.constant 0 : i32
    %c0_i32_0 = arith.constant 0 : i32
    %c0_i32_1 = arith.constant 0 : i32
    return %c0_i32, %c0_i32_0 : i32, i32
  }
  func.func @transform_2(%arg0: i32) -> (i32, i32) {
    %c0_i32 = arith.constant 0 : i32
    %c0_i32_0 = arith.constant 0 : i32
    %c0_i32_1 = arith.constant 0 : i32
    return %c0_i32, %c0_i32_0 : i32, i32
  }
  func.func @transform_3(%arg0: i32) -> (i32, i32) {
    %c0_i32 = arith.constant 0 : i32
    %c0_i32_0 = arith.constant 0 : i32
    return %arg0, %c0_i32 : i32, i32
  }
}

</mosaic_0001>

<bundles_post_ra>
// kernel: tpu_custom_call.1
= control target key start
LH: loop header
LB: loop body
LE: loop exit
PB: predicated region body
PF: predicated region fallthrough
CT: control target
= control target key end

     0   :  { %s1463_s12 = smov 0   ;;  %s2141_s0 = inlined_call_operand.vmem [shape: f32[2048,4], index: 0, kind: input, shape index: {}]   ;;  %s2142_s1 = inlined_call_operand.vmem [shape: f32[4,8], index: 1, kind: input, shape index: {}]   ;;  %s2143_s2 = inlined_call_operand.vmem [shape: f32[1,8], index: 2, kind: input, shape index: {}]   ;;  %s2144_s3 = inlined_call_operand.vmem [shape: f32[2048,8], index: 3, kind: output, shape index: {}]  }
   0x1 LB: > { %s1282_s13 = sadd.s32 4294967295, %s1441_s12   ;;  %p1286_p0 = scmp.ge.s32.totalorder %s1441_s12, 1  ;;  %s1441_s12 = sphi %s1463_s12, %s13_s12  }
   0x2   : > { %p138_p1 = scmp.lt.s32.totalorder %s1441_s12, 3 }
   0x4   : > { %p139_p2 = pnand %p1286_p0, %p138_p1 }
   0x5   : > { %s1287_s16 = sshll.u32 (!%p139_p2), %s1282_s13, 7 }
   0x6   : > { %142 = sbr.rel (%p139_p2) target bundleno = 399 (0x18f), region = 32  ;;  %p163_p3 = scmp.lt.s32.totalorder (!%p139_p2), %s1287_s16, 255 }
   0xb   : > { %v302_v0 = vld [vmem:[%s2142_s1] sm:$0xf]  ;;  %vm692_vm0 = vcmask 1043456   ;;  %s2146_s16 = smov (!%p163_p3, %s1287_s16), 255  ;;  %vm307_vm1 = vcmask 31744   ;;  %vm1097_vm2 = vcmask 64512  }
   0xc   : > { %1423 = vmatpush.msk.msra.mxu2 %vm692_vm0, %v302_v0  ;;  %1424 = vmatpush.msk.msra.mxu3 %vm692_vm0, %v302_v0  ;;  %s1288_s17 = sshll.u32 %s2146_s16, 3 }
   0xd   : > { %1291 = vmatpush.msk.msra.mxu0 %vm692_vm0, %v302_v0  ;;  %1422 = vmatpush.msk.msra.mxu1 %vm692_vm0, %v302_v0  ;;  %s1482_s20 = scalar_lea.vmem %s2141_s0, %s1288_s17  ;;  %s1624_s25 = scalar_lea.vmem %s2144_s3, %s1288_s17 }
   0xe   : > { %v238_v1 = vld [vmem:[%s1482_s20 + $0x200] sm:$0xff]  ;;  %v239_v5 = vld [vmem:[%s1482_s20 + $0x208] sm:$0xff]  ;;  %v240_v9 = vld [vmem:[%s1482_s20 + $0x210] sm:$0xff] }
   0xf   : > { %v270_v2 = vld [vmem:[%s1482_s20 + $0x300] sm:$0xff]  ;;  %1356 = vmatmul.msk.f32.vlgmr.msra.gmra.mxu2 %vm307_vm1, %v238_v1  ;;  %v271_v6 = vld [vmem:[%s1482_s20 + $0x308] sm:$0xff]  ;;  %v272_v10 = vld [vmem:[%s1482_s20 + $0x310] sm:$0xff] }
  0x10   : > { %v174_v3 = vld [vmem:[%s1482_s20] sm:$0xff]  ;;  %1388 = vmatmul.msk.f32.vlgmr.msra.gmra.mxu3 %vm307_vm1, %v270_v2  ;;  %v175_v7 = vld [vmem:[%s1482_s20 + $0x8] sm:$0xff]  ;;  %v176_v11 = vld [vmem:[%s1482_s20 + $0x10] sm:$0xff] }
  0x11   : > { %v206_v4 = vld [vmem:[%s1482_s20 + $0x100] sm:$0xff]  ;;  %1292 = vmatmul.msk.f32.vlgmr.msra.gmra.mxu0 %vm307_vm1, %v174_v3  ;;  %v207_v8 = vld [vmem:[%s1482_s20 + $0x108] sm:$0xff]  ;;  %v208_v12 = vld [vmem:[%s1482_s20 + $0x110] sm:$0xff] }
  0x12   : > { %1324 = vmatmul.msk.f32.vlgmr.msra.gmra.mxu1 %vm307_vm1, %v206_v4  ;;  %v241_v13 = vld [vmem:[%s1482_s20 + $0x218] sm:$0xff]  ;;  %v242_v17 = vld [vmem:[%s1482_s20 + $0x220] sm:$0xff]  ;;  %v243_v21 = vld [vmem:[%s1482_s20 + $0x228] sm:$0xff] }
  0x13   : > { %v273_v14 = vld [vmem:[%s1482_s20 + $0x318] sm:$0xff]  ;;  %v274_v18 = vld [vmem:[%s1482_s20 + $0x320] sm:$0xff]  ;;  %v275_v22 = vld [vmem:[%s1482_s20 + $0x328] sm:$0xff] }
  0x14   : > { %v177_v15 = vld [vmem:[%s1482_s20 + $0x18] sm:$0xff]  ;;  %v178_v19 = vld [vmem:[%s1482_s20 + $0x20] sm:$0xff]  ;;  %v179_v23 = vld [vmem:[%s1482_s20 + $0x28] sm:$0xff] }
  0x15   : > { %v209_v16 = vld [vmem:[%s1482_s20 + $0x118] sm:$0xff]  ;;  %v210_v20 = vld [vmem:[%s1482_s20 + $0x120] sm:$0xff]  ;;  %v211_v24 = vld [vmem:[%s1482_s20 + $0x128] sm:$0xff] }
  0x16   : > { %v244_v25 = vld [vmem:[%s1482_s20 + $0x230] sm:$0xff]  ;;  %v245_v29 = vld [vmem:[%s1482_s20 + $0x238] sm:$0xff]  ;;  %v246_v33 = vld [vmem:[%s1482_s20 + $0x240] sm:$0xff] }
  0x17   : > { %1357 = vmatmul.msk.f32.gmra.mxu2 %vm307_vm1, %v239_v5  ;;  %v276_v26 = vld [vmem:[%s1482_s20 + $0x330] sm:$0xff]  ;;  %v277_v30 = vld [vmem:[%s1482_s20 + $0x338] sm:$0xff]  ;;  %v278_v34 = vld [vmem:[%s1482_s20 + $0x340] sm:$0xff] }
  0x18   : > { %1389 = vmatmul.msk.f32.gmra.mxu3 %vm307_vm1, %v271_v6  ;;  %v180_v27 = vld [vmem:[%s1482_s20 + $0x30] sm:$0xff]  ;;  %v181_v31 = vld [vmem:[%s1482_s20 + $0x38] sm:$0xff]  ;;  %v182_v35 = vld [vmem:[%s1482_s20 + $0x40] sm:$0xff] }
  0x19   : > { %1293 = vmatmul.msk.f32.gmra.mxu0 %vm307_vm1, %v175_v7  ;;  %v212_v28 = vld [vmem:[%s1482_s20 + $0x130] sm:$0xff]  ;;  %v213_v32 = vld [vmem:[%s1482_s20 + $0x138] sm:$0xff]  ;;  %v214_v36 = vld [vmem:[%s1482_s20 + $0x140] sm:$0xff] }
  0x1a   : > { %1325 = vmatmul.msk.f32.gmra.mxu1 %vm307_vm1, %v207_v8  ;;  %v247_v37 = vld [vmem:[%s1482_s20 + $0x248] sm:$0xff]  ;;  %v248_v41 = vld [vmem:[%s1482_s20 + $0x250] sm:$0xff]  ;;  %v249_v45 = vld [vmem:[%s1482_s20 + $0x258] sm:$0xff] }
  0x1b   : > { %v279_v38 = vld [vmem:[%s1482_s20 + $0x348] sm:$0xff]  ;;  %v280_v42 = vld [vmem:[%s1482_s20 + $0x350] sm:$0xff]  ;;  %v281_v46 = vld [vmem:[%s1482_s20 + $0x358] sm:$0xff] }
  0x1c   : > { %v183_v39 = vld [vmem:[%s1482_s20 + $0x48] sm:$0xff]  ;;  %v184_v43 = vld [vmem:[%s1482_s20 + $0x50] sm:$0xff]  ;;  %v185_v47 = vld [vmem:[%s1482_s20 + $0x58] sm:$0xff] }
  0x1d   : > { %v215_v40 = vld [vmem:[%s1482_s20 + $0x148] sm:$0xff]  ;;  %v216_v44 = vld [vmem:[%s1482_s20 + $0x150] sm:$0xff]  ;;  %v217_v48 = vld [vmem:[%s1482_s20 + $0x158] sm:$0xff] }
  0x1e   : > { %v250_v49 = vld [vmem:[%s1482_s20 + $0x260] sm:$0xff]  ;;  %v251_v53 = vld [vmem:[%s1482_s20 + $0x268] sm:$0xff]  ;;  %v252_v57 = vld [vmem:[%s1482_s20 + $0x270] sm:$0xff] }
  0x1f   : > { %1358 = vmatmul.msk.f32.gmra.mxu2 %vm307_vm1, %v240_v9  ;;  %v282_v50 = vld [vmem:[%s1482_s20 + $0x360] sm:$0xff]  ;;  %v283_v54 = vld [vmem:[%s1482_s20 + $0x368] sm:$0xff]  ;;  %v284_v58 = vld [vmem:[%s1482_s20 + $0x370] sm:$0xff] }
  0x20   : > { %1390 = vmatmul.msk.f32.gmra.mxu3 %vm307_vm1, %v272_v10  ;;  %v186_v51 = vld [vmem:[%s1482_s20 + $0x60] sm:$0xff]  ;;  %v187_v55 = vld [vmem:[%s1482_s20 + $0x68] sm:$0xff]  ;;  %v188_v59 = vld [vmem:[%s1482_s20 + $0x70] sm:$0xff] }
  0x21   : > { %1294 = vmatmul.msk.f32.gmra.mxu0 %vm307_vm1, %v176_v11  ;;  %v218_v52 = vld [vmem:[%s1482_s20 + $0x160] sm:$0xff]  ;;  %v219_v56 = vld [vmem:[%s1482_s20 + $0x168] sm:$0xff]  ;;  %v220_v60 = vld [vmem:[%s1482_s20 + $0x170] sm:$0xff] }
  0x22   : > { %1326 = vmatmul.msk.f32.gmra.mxu1 %vm307_vm1, %v208_v12  ;;  %v253_v61 = vld [vmem:[%s1482_s20 + $0x278] sm:$0xff]  ;;  %v1615_v1 = vld [vmem:[%s2143_s2] ss:$0 sm:$0xff] }
  0x23   : > { %v285_v62 = vld [vmem:[%s1482_s20 + $0x378] sm:$0xff]  ;;  %v254_v2 = vld [vmem:[%s1482_s20 + $0x280] sm:$0xff] }
  0x24   : > { %v189_v63 = vld [vmem:[%s1482_s20 + $0x78] sm:$0xff]  ;;  %v286_v3 = vld [vmem:[%s1482_s20 + $0x380] sm:$0xff] }
  0x25   : > { %v221_v0 = vld [vmem:[%s1482_s20 + $0x178] sm:$0xff]  ;;  %v190_v6 = vld [vmem:[%s1482_s20 + $0x80] sm:$0xff] }
  0x26   : > { %v222_v7 = vld [vmem:[%s1482_s20 + $0x180] sm:$0xff] }
  0x27   : > { %1359 = vmatmul.msk.f32.gmra.mxu2 %vm307_vm1, %v241_v13 }
  0x28   : > { %1391 = vmatmul.msk.f32.gmra.mxu3 %vm307_vm1, %v273_v14  ;;  %v255_v14 = vld [vmem:[%s1482_s20 + $0x288] sm:$0xff] }
  0x29   : > { %1295 = vmatmul.msk.f32.gmra.mxu0 %vm307_vm1, %v177_v15  ;;  %v287_v15 = vld [vmem:[%s1482_s20 + $0x388] sm:$0xff] }
  0x2a   : > { %1327 = vmatmul.msk.f32.gmra.mxu1 %vm307_vm1, %v209_v16 }
  0x2f   : > { %1360 = vmatmul.msk.f32.gmra.mxu2 %vm307_vm1, %v242_v17 }
  0x30   : > { %1392 = vmatmul.msk.f32.gmra.mxu3 %vm307_vm1, %v274_v18  ;;  %v191_v18 = vld [vmem:[%s1482_s20 + $0x88] sm:$0xff] }
  0x31   : > { %1296 = vmatmul.msk.f32.gmra.mxu0 %vm307_vm1, %v178_v19  ;;  %v223_v19 = vld [vmem:[%s1482_s20 + $0x188] sm:$0xff] }
  0x32   : > { %1328 = vmatmul.msk.f32.gmra.mxu1 %vm307_vm1, %v210_v20 }
  0x37   : > { %1361 = vmatmul.msk.f32.gmra.mxu2 %vm307_vm1, %v243_v21 }
  0x38   : > { %1393 = vmatmul.msk.f32.gmra.mxu3 %vm307_vm1, %v275_v22 }
  0x39   : > { %1297 = vmatmul.msk.f32.gmra.mxu0 %vm307_vm1, %v179_v23 }
  0x3a   : > { %1329 = vmatmul.msk.f32.gmra.mxu1 %vm307_vm1, %v211_v24 }
  0x3f   : > { %1362 = vmatmul.msk.f32.gmra.mxu2 %vm307_vm1, %v244_v25 }
  0x40   : > { %1394 = vmatmul.msk.f32.gmra.mxu3 %vm307_vm1, %v276_v26  ;;  %v256_v26 = vld [vmem:[%s1482_s20 + $0x290] sm:$0xff] }
  0x41   : > { %1298 = vmatmul.msk.f32.gmra.mxu0 %vm307_vm1, %v180_v27  ;;  %v288_v27 = vld [vmem:[%s1482_s20 + $0x390] sm:$0xff] }
  0x42   : > { %1330 = vmatmul.msk.f32.gmra.mxu1 %vm307_vm1, %v212_v28 }
  0x47   : > { %1363 = vmatmul.msk.f32.gmra.mxu2 %vm307_vm1, %v245_v29 }
  0x48   : > { %1395 = vmatmul.msk.f32.gmra.mxu3 %vm307_vm1, %v277_v30  ;;  %v192_v30 = vld [vmem:[%s1482_s20 + $0x90] sm:$0xff] }
  0x49   : > { %1299 = vmatmul.msk.f32.gmra.mxu0 %vm307_vm1, %v181_v31  ;;  %v224_v31 = vld [vmem:[%s1482_s20 + $0x190] sm:$0xff] }
  0x4a   : > { %1331 = vmatmul.msk.f32.gmra.mxu1 %vm307_vm1, %v213_v32 }
  0x4f   : > { %1364 = vmatmul.msk.f32.gmra.mxu2 %vm307_vm1, %v246_v33 }
  0x50   : > { %1396 = vmatmul.msk.f32.gmra.mxu3 %vm307_vm1, %v278_v34 }
  0x51   : > { %1300 = vmatmul.msk.f32.gmra.mxu0 %vm307_vm1, %v182_v35 }
  0x52   : > { %1332 = vmatmul.msk.f32.gmra.mxu1 %vm307_vm1, %v214_v36 }
  0x57   : > { %1365 = vmatmul.msk.f32.gmra.mxu2 %vm307_vm1, %v247_v37 }
  0x58   : > { %1397 = vmatmul.msk.f32.gmra.mxu3 %vm307_vm1, %v279_v38  ;;  %v257_v38 = vld [vmem:[%s1482_s20 + $0x298] sm:$0xff] }
  0x59   : > { %1301 = vmatmul.msk.f32.gmra.mxu0 %vm307_vm1, %v183_v39  ;;  %v289_v39 = vld [vmem:[%s1482_s20 + $0x398] sm:$0xff] }
  0x5a   : > { %1333 = vmatmul.msk.f32.gmra.mxu1 %vm307_vm1, %v215_v40 }
  0x5f   : > { %1366 = vmatmul.msk.f32.gmra.mxu2 %vm307_vm1, %v248_v41 }
  0x60   : > { %1398 = vmatmul.msk.f32.gmra.mxu3 %vm307_vm1, %v280_v42  ;;  %v193_v42 = vld [vmem:[%s1482_s20 + $0x98] sm:$0xff] }
  0x61   : > { %1302 = vmatmul.msk.f32.gmra.mxu0 %vm307_vm1, %v184_v43  ;;  %v225_v43 = vld [vmem:[%s1482_s20 + $0x198] sm:$0xff] }
  0x62   : > { %1334 = vmatmul.msk.f32.gmra.mxu1 %vm307_vm1, %v216_v44 }
  0x67   : > { %1367 = vmatmul.msk.f32.gmra.mxu2 %vm307_vm1, %v249_v45 }
  0x68   : > { %1399 = vmatmul.msk.f32.gmra.mxu3 %vm307_vm1, %v281_v46 }
  0x69   : > { %1303 = vmatmul.msk.f32.gmra.mxu0 %vm307_vm1, %v185_v47 }
  0x6a   : > { %1335 = vmatmul.msk.f32.gmra.mxu1 %vm307_vm1, %v217_v48 }
  0x6f   : > { %1368 = vmatmul.msk.f32.gmra.mxu2 %vm307_vm1, %v250_v49 }
  0x70   : > { %1400 = vmatmul.msk.f32.gmra.mxu3 %vm307_vm1, %v282_v50  ;;  %v258_v50 = vld [vmem:[%s1482_s20 + $0x2a0] sm:$0xff] }
  0x71   : > { %1304 = vmatmul.msk.f32.gmra.mxu0 %vm307_vm1, %v186_v51  ;;  %v290_v51 = vld [vmem:[%s1482_s20 + $0x3a0] sm:$0xff] }
  0x72   : > { %1336 = vmatmul.msk.f32.gmra.mxu1 %vm307_vm1, %v218_v52 }
  0x77   : > { %1369 = vmatmul.msk.f32.gmra.mxu2 %vm307_vm1, %v251_v53 }
  0x78   : > { %1401 = vmatmul.msk.f32.gmra.mxu3 %vm307_vm1, %v283_v54  ;;  %v194_v54 = vld [vmem:[%s1482_s20 + $0xa0] sm:$0xff] }
  0x79   : > { %1305 = vmatmul.msk.f32.gmra.mxu0 %vm307_vm1, %v187_v55  ;;  %v226_v55 = vld [vmem:[%s1482_s20 + $0x1a0] sm:$0xff] }
  0x7a   : > { %1337 = vmatmul.msk.f32.gmra.mxu1 %vm307_vm1, %v219_v56 }
  0x7f   : > { %1370 = vmatmul.msk.f32.gmra.mxu2 %vm307_vm1, %v252_v57 }
  0x80   : > { %1402 = vmatmul.msk.f32.gmra.mxu3 %vm307_vm1, %v284_v58 }
  0x81   : > { %1306 = vmatmul.msk.f32.gmra.mxu0 %vm307_vm1, %v188_v59 }
  0x82   : > { %1338 = vmatmul.msk.f32.gmra.mxu1 %vm307_vm1, %v220_v60 }
  0x87   : > { %1371 = vmatmul.msk.f32.gmra.mxu2 %vm307_vm1, %v253_v61 }
  0x88   : > { %1403 = vmatmul.msk.f32.gmra.mxu3 %vm307_vm1, %v285_v62  ;;  %v259_v62 = vld [vmem:[%s1482_s20 + $0x2a8] sm:$0xff] }
  0x89   : > { %1307 = vmatmul.msk.f32.gmra.mxu0 %vm307_vm1, %v189_v63  ;;  %v291_v63 = vld [vmem:[%s1482_s20 + $0x3a8] sm:$0xff] }
  0x8a   : > { %1339 = vmatmul.msk.f32.gmra.mxu1 %vm307_vm1, %v221_v0 }
  0x8e   : > { %v713_v4 = vpop.f32.mrf.mxu0 }
  0x8f   : > { %v809_v5 = vpop.f32.mrf.mxu1  ;;  %v714_v8 = vadd.f32 %v1615_v1, %v713_v4  ;;  %1372 = vmatmul.msk.f32.gmra.mxu2 %vm307_vm1, %v254_v2  ;;  %v227_v4 = vld [vmem:[%s1482_s20 + $0x1a8] sm:$0xff] }
  0x90   : > { %v810_v9 = vadd.f32 %v1615_v1, %v809_v5  ;;  %1404 = vmatmul.msk.f32.gmra.mxu3 %vm307_vm1, %v286_v3  ;;  %v195_v3 = vld [vmem:[%s1482_s20 + $0xa8] sm:$0xff] }
  0x91   : > { %1098 = vst.msk [vmem:[%s1624_s25] sm:$0xff] %vm1097_vm2, %v714_v8  ;;  %1308 = vmatmul.msk.f32.gmra.mxu0 %vm307_vm1, %v190_v6 }
  0x92   : > { %1340 = vmatmul.msk.f32.gmra.mxu1 %vm307_vm1, %v222_v7  ;;  %1130 = vst.msk [vmem:[%s1624_s25 + $0x100] sm:$0xff] %vm1097_vm2, %v810_v9  ;;  %v905_v10 = vpop.f32.mrf.mxu2 }
  0x93   : > { %v1001_v11 = vpop.f32.mrf.mxu3  ;;  %v906_v12 = vadd.f32 %v1615_v1, %v905_v10 }
  0x94   : > { %v1002_v13 = vadd.f32 %v1615_v1, %v1001_v11  ;;  %v260_v11 = vld [vmem:[%s1482_s20 + $0x2b0] sm:$0xff] }
  0x95   : > { %1162 = vst.msk [vmem:[%s1624_s25 + $0x200] sm:$0xff] %vm1097_vm2, %v906_v12  ;;  %v292_v12 = vld [vmem:[%s1482_s20 + $0x3b0] sm:$0xff] }
  0x96   : > { %v716_v16 = vpop.f32.mrf.mxu0  ;;  %1194 = vst.msk [vmem:[%s1624_s25 + $0x300] sm:$0xff] %vm1097_vm2, %v1002_v13 }
  0x97   : > { %v812_v17 = vpop.f32.mrf.mxu1  ;;  %v717_v20 = vadd.f32 %v1615_v1, %v716_v16  ;;  %1373 = vmatmul.msk.f32.gmra.mxu2 %vm307_vm1, %v255_v14  ;;  %v228_v16 = vld [vmem:[%s1482_s20 + $0x1b0] sm:$0xff] }
  0x98   : > { %v813_v21 = vadd.f32 %v1615_v1, %v812_v17  ;;  %1405 = vmatmul.msk.f32.gmra.mxu3 %vm307_vm1, %v287_v15  ;;  %v196_v15 = vld [vmem:[%s1482_s20 + $0xb0] sm:$0xff] }
  0x99   : > { %1099 = vst.msk [vmem:[%s1624_s25 + $0x8] sm:$0xff] %vm1097_vm2, %v717_v20  ;;  %1309 = vmatmul.msk.f32.gmra.mxu0 %vm307_vm1, %v191_v18 }
  0x9a   : > { %1341 = vmatmul.msk.f32.gmra.mxu1 %vm307_vm1, %v223_v19  ;;  %1131 = vst.msk [vmem:[%s1624_s25 + $0x108] sm:$0xff] %vm1097_vm2, %v813_v21  ;;  %v908_v22 = vpop.f32.mrf.mxu2 }
  0x9b   : > { %v1004_v23 = vpop.f32.mrf.mxu3  ;;  %v909_v24 = vadd.f32 %v1615_v1, %v908_v22 }
  0x9c   : > { %v1005_v25 = vadd.f32 %v1615_v1, %v1004_v23  ;;  %v261_v23 = vld [vmem:[%s1482_s20 + $0x2b8] sm:$0xff] }
  0x9d   : > { %1163 = vst.msk [vmem:[%s1624_s25 + $0x208] sm:$0xff] %vm1097_vm2, %v909_v24  ;;  %v293_v24 = vld [vmem:[%s1482_s20 + $0x3b8] sm:$0xff] }
  0x9e   : > { %v719_v28 = vpop.f32.mrf.mxu0  ;;  %1195 = vst.msk [vmem:[%s1624_s25 + $0x308] sm:$0xff] %vm1097_vm2, %v1005_v25 }
  0x9f   : > { %v815_v29 = vpop.f32.mrf.mxu1  ;;  %v720_v32 = vadd.f32 %v1615_v1, %v719_v28  ;;  %1374 = vmatmul.msk.f32.gmra.mxu2 %vm307_vm1, %v256_v26  ;;  %v229_v28 = vld [vmem:[%s1482_s20 + $0x1b8] sm:$0xff] }
  0xa0   : > { %v816_v33 = vadd.f32 %v1615_v1, %v815_v29  ;;  %1406 = vmatmul.msk.f32.gmra.mxu3 %vm307_vm1, %v288_v27  ;;  %v197_v27 = vld [vmem:[%s1482_s20 + $0xb8] sm:$0xff] }
  0xa1   : > { %1100 = vst.msk [vmem:[%s1624_s25 + $0x10] sm:$0xff] %vm1097_vm2, %v720_v32  ;;  %1310 = vmatmul.msk.f32.gmra.mxu0 %vm307_vm1, %v192_v30 }
  0xa2   : > { %1342 = vmatmul.msk.f32.gmra.mxu1 %vm307_vm1, %v224_v31  ;;  %1132 = vst.msk [vmem:[%s1624_s25 + $0x110] sm:$0xff] %vm1097_vm2, %v816_v33  ;;  %v911_v34 = vpop.f32.mrf.mxu2 }
  0xa3   : > { %v1007_v35 = vpop.f32.mrf.mxu3  ;;  %v912_v36 = vadd.f32 %v1615_v1, %v911_v34 }
  0xa4   : > { %v1008_v37 = vadd.f32 %v1615_v1, %v1007_v35  ;;  %v262_v35 = vld [vmem:[%s1482_s20 + $0x2c0] sm:$0xff] }
  0xa5   : > { %1164 = vst.msk [vmem:[%s1624_s25 + $0x210] sm:$0xff] %vm1097_vm2, %v912_v36  ;;  %v294_v36 = vld [vmem:[%s1482_s20 + $0x3c0] sm:$0xff] }
  0xa6   : > { %v722_v40 = vpop.f32.mrf.mxu0  ;;  %1196 = vst.msk [vmem:[%s1624_s25 + $0x310] sm:$0xff] %vm1097_vm2, %v1008_v37 }
  0xa7   : > { %v818_v41 = vpop.f32.mrf.mxu1  ;;  %v723_v44 = vadd.f32 %v1615_v1, %v722_v40  ;;  %1375 = vmatmul.msk.f32.gmra.mxu2 %vm307_vm1, %v257_v38  ;;  %v230_v40 = vld [vmem:[%s1482_s20 + $0x1c0] sm:$0xff] }
  0xa8   : > { %v819_v45 = vadd.f32 %v1615_v1, %v818_v41  ;;  %1407 = vmatmul.msk.f32.gmra.mxu3 %vm307_vm1, %v289_v39  ;;  %v198_v39 = vld [vmem:[%s1482_s20 + $0xc0] sm:$0xff] }
  0xa9   : > { %1101 = vst.msk [vmem:[%s1624_s25 + $0x18] sm:$0xff] %vm1097_vm2, %v723_v44  ;;  %1311 = vmatmul.msk.f32.gmra.mxu0 %vm307_vm1, %v193_v42 }
  0xaa   : > { %1343 = vmatmul.msk.f32.gmra.mxu1 %vm307_vm1, %v225_v43  ;;  %1133 = vst.msk [vmem:[%s1624_s25 + $0x118] sm:$0xff] %vm1097_vm2, %v819_v45  ;;  %v914_v46 = vpop.f32.mrf.mxu2 }
  0xab   : > { %v1010_v47 = vpop.f32.mrf.mxu3  ;;  %v915_v48 = vadd.f32 %v1615_v1, %v914_v46 }
  0xac   : > { %v1011_v49 = vadd.f32 %v1615_v1, %v1010_v47  ;;  %v263_v47 = vld [vmem:[%s1482_s20 + $0x2c8] sm:$0xff] }
  0xad   : > { %1165 = vst.msk [vmem:[%s1624_s25 + $0x218] sm:$0xff] %vm1097_vm2, %v915_v48  ;;  %v295_v48 = vld [vmem:[%s1482_s20 + $0x3c8] sm:$0xff] }
  0xae   : > { %v725_v52 = vpop.f32.mrf.mxu0  ;;  %1197 = vst.msk [vmem:[%s1624_s25 + $0x318] sm:$0xff] %vm1097_vm2, %v1011_v49 }
  0xaf   : > { %v821_v53 = vpop.f32.mrf.mxu1  ;;  %v726_v56 = vadd.f32 %v1615_v1, %v725_v52  ;;  %1376 = vmatmul.msk.f32.gmra.mxu2 %vm307_vm1, %v258_v50  ;;  %v231_v52 = vld [vmem:[%s1482_s20 + $0x1c8] sm:$0xff] }
  0xb0   : > { %v822_v57 = vadd.f32 %v1615_v1, %v821_v53  ;;  %1408 = vmatmul.msk.f32.gmra.mxu3 %vm307_vm1, %v290_v51  ;;  %v199_v51 = vld [vmem:[%s1482_s20 + $0xc8] sm:$0xff] }
  0xb1   : > { %1102 = vst.msk [vmem:[%s1624_s25 + $0x20] sm:$0xff] %vm1097_vm2, %v726_v56  ;;  %1312 = vmatmul.msk.f32.gmra.mxu0 %vm307_vm1, %v194_v54 }
  0xb2   : > { %1344 = vmatmul.msk.f32.gmra.mxu1 %vm307_vm1, %v226_v55  ;;  %1134 = vst.msk [vmem:[%s1624_s25 + $0x120] sm:$0xff] %vm1097_vm2, %v822_v57  ;;  %v917_v58 = vpop.f32.mrf.mxu2 }
  0xb3   : > { %v1013_v59 = vpop.f32.mrf.mxu3  ;;  %v918_v60 = vadd.f32 %v1615_v1, %v917_v58 }
  0xb4   : > { %v1014_v61 = vadd.f32 %v1615_v1, %v1013_v59  ;;  %v264_v59 = vld [vmem:[%s1482_s20 + $0x2d0] sm:$0xff] }
  0xb5   : > { %1166 = vst.msk [vmem:[%s1624_s25 + $0x220] sm:$0xff] %vm1097_vm2, %v918_v60  ;;  %v296_v60 = vld [vmem:[%s1482_s20 + $0x3d0] sm:$0xff] }
  0xb6   : > { %v728_v0 = vpop.f32.mrf.mxu0  ;;  %1198 = vst.msk [vmem:[%s1624_s25 + $0x320] sm:$0xff] %vm1097_vm2, %v1014_v61 }
  0xb7   : > { %v824_v2 = vpop.f32.mrf.mxu1  ;;  %v729_v5 = vadd.f32 %v1615_v1, %v728_v0  ;;  %1377 = vmatmul.msk.f32.gmra.mxu2 %vm307_vm1, %v259_v62  ;;  %v232_v0 = vld [vmem:[%s1482_s20 + $0x1d0] sm:$0xff] }
  0xb8   : > { %v825_v6 = vadd.f32 %v1615_v1, %v824_v2  ;;  %1409 = vmatmul.msk.f32.gmra.mxu3 %vm307_vm1, %v291_v63  ;;  %v200_v63 = vld [vmem:[%s1482_s20 + $0xd0] sm:$0xff] }
  0xb9   : > { %1103 = vst.msk [vmem:[%s1624_s25 + $0x28] sm:$0xff] %vm1097_vm2, %v729_v5  ;;  %1313 = vmatmul.msk.f32.gmra.mxu0 %vm307_vm1, %v195_v3 }
  0xba   : > { %1345 = vmatmul.msk.f32.gmra.mxu1 %vm307_vm1, %v227_v4  ;;  %1135 = vst.msk [vmem:[%s1624_s25 + $0x128] sm:$0xff] %vm1097_vm2, %v825_v6  ;;  %v920_v7 = vpop.f32.mrf.mxu2 }
  0xbb   : > { %v1016_v8 = vpop.f32.mrf.mxu3  ;;  %v921_v9 = vadd.f32 %v1615_v1, %v920_v7 }
  0xbc   : > { %v1017_v10 = vadd.f32 %v1615_v1, %v1016_v8  ;;  %v265_v8 = vld [vmem:[%s1482_s20 + $0x2d8] sm:$0xff] }
  0xbd   : > { %1167 = vst.msk [vmem:[%s1624_s25 + $0x228] sm:$0xff] %vm1097_vm2, %v921_v9  ;;  %v297_v9 = vld [vmem:[%s1482_s20 + $0x3d8] sm:$0xff] }
  0xbe   : > { %v731_v13 = vpop.f32.mrf.mxu0  ;;  %1199 = vst.msk [vmem:[%s1624_s25 + $0x328] sm:$0xff] %vm1097_vm2, %v1017_v10 }
  0xbf   : > { %v827_v14 = vpop.f32.mrf.mxu1  ;;  %v732_v17 = vadd.f32 %v1615_v1, %v731_v13  ;;  %1378 = vmatmul.msk.f32.gmra.mxu2 %vm307_vm1, %v260_v11  ;;  %v233_v13 = vld [vmem:[%s1482_s20 + $0x1d8] sm:$0xff] }
  0xc0   : > { %v828_v18 = vadd.f32 %v1615_v1, %v827_v14  ;;  %1410 = vmatmul.msk.f32.gmra.mxu3 %vm307_vm1, %v292_v12  ;;  %v201_v12 = vld [vmem:[%s1482_s20 + $0xd8] sm:$0xff] }
  0xc1   : > { %1104 = vst.msk [vmem:[%s1624_s25 + $0x30] sm:$0xff] %vm1097_vm2, %v732_v17  ;;  %1314 = vmatmul.msk.f32.gmra.mxu0 %vm307_vm1, %v196_v15 }
  0xc2   : > { %1346 = vmatmul.msk.f32.gmra.mxu1 %vm307_vm1, %v228_v16  ;;  %1136 = vst.msk [vmem:[%s1624_s25 + $0x130] sm:$0xff] %vm1097_vm2, %v828_v18  ;;  %v923_v19 = vpop.f32.mrf.mxu2 }
  0xc3   : > { %v1019_v20 = vpop.f32.mrf.mxu3  ;;  %v924_v21 = vadd.f32 %v1615_v1, %v923_v19 }
  0xc4   : > { %v1020_v22 = vadd.f32 %v1615_v1, %v1019_v20  ;;  %v266_v20 = vld [vmem:[%s1482_s20 + $0x2e0] sm:$0xff] }
  0xc5   : > { %1168 = vst.msk [vmem:[%s1624_s25 + $0x230] sm:$0xff] %vm1097_vm2, %v924_v21  ;;  %v298_v21 = vld [vmem:[%s1482_s20 + $0x3e0] sm:$0xff] }
  0xc6   : > { %v734_v25 = vpop.f32.mrf.mxu0  ;;  %1200 = vst.msk [vmem:[%s1624_s25 + $0x330] sm:$0xff] %vm1097_vm2, %v1020_v22 }
  0xc7   : > { %v830_v26 = vpop.f32.mrf.mxu1  ;;  %v735_v29 = vadd.f32 %v1615_v1, %v734_v25  ;;  %1379 = vmatmul.msk.f32.gmra.mxu2 %vm307_vm1, %v261_v23  ;;  %v234_v25 = vld [vmem:[%s1482_s20 + $0x1e0] sm:$0xff] }
  0xc8   : > { %v831_v30 = vadd.f32 %v1615_v1, %v830_v26  ;;  %1411 = vmatmul.msk.f32.gmra.mxu3 %vm307_vm1, %v293_v24  ;;  %v202_v24 = vld [vmem:[%s1482_s20 + $0xe0] sm:$0xff] }
  0xc9   : > { %1105 = vst.msk [vmem:[%s1624_s25 + $0x38] sm:$0xff] %vm1097_vm2, %v735_v29  ;;  %1315 = vmatmul.msk.f32.gmra.mxu0 %vm307_vm1, %v197_v27 }
  0xca   : > { %1347 = vmatmul.msk.f32.gmra.mxu1 %vm307_vm1, %v229_v28  ;;  %1137 = vst.msk [vmem:[%s1624_s25 + $0x138] sm:$0xff] %vm1097_vm2, %v831_v30  ;;  %v926_v31 = vpop.f32.mrf.mxu2 }
  0xcb   : > { %v1022_v32 = vpop.f32.mrf.mxu3  ;;  %v927_v33 = vadd.f32 %v1615_v1, %v926_v31 }
  0xcc   : > { %v1023_v34 = vadd.f32 %v1615_v1, %v1022_v32  ;;  %v267_v32 = vld [vmem:[%s1482_s20 + $0x2e8] sm:$0xff] }
  0xcd   : > { %1169 = vst.msk [vmem:[%s1624_s25 + $0x238] sm:$0xff] %vm1097_vm2, %v927_v33  ;;  %v299_v33 = vld [vmem:[%s1482_s20 + $0x3e8] sm:$0xff] }
  0xce   : > { %v737_v37 = vpop.f32.mrf.mxu0  ;;  %1201 = vst.msk [vmem:[%s1624_s25 + $0x338] sm:$0xff] %vm1097_vm2, %v1023_v34 }
  0xcf   : > { %v833_v38 = vpop.f32.mrf.mxu1  ;;  %v738_v41 = vadd.f32 %v1615_v1, %v737_v37  ;;  %1380 = vmatmul.msk.f32.gmra.mxu2 %vm307_vm1, %v262_v35  ;;  %v235_v37 = vld [vmem:[%s1482_s20 + $0x1e8] sm:$0xff] }
  0xd0   : > { %v834_v42 = vadd.f32 %v1615_v1, %v833_v38  ;;  %1412 = vmatmul.msk.f32.gmra.mxu3 %vm307_vm1, %v294_v36  ;;  %v203_v36 = vld [vmem:[%s1482_s20 + $0xe8] sm:$0xff] }
  0xd1   : > { %1106 = vst.msk [vmem:[%s1624_s25 + $0x40] sm:$0xff] %vm1097_vm2, %v738_v41  ;;  %1316 = vmatmul.msk.f32.gmra.mxu0 %vm307_vm1, %v198_v39 }
  0xd2   : > { %1348 = vmatmul.msk.f32.gmra.mxu1 %vm307_vm1, %v230_v40  ;;  %1138 = vst.msk [vmem:[%s1624_s25 + $0x140] sm:$0xff] %vm1097_vm2, %v834_v42  ;;  %v929_v43 = vpop.f32.mrf.mxu2 }
  0xd3   : > { %v1025_v44 = vpop.f32.mrf.mxu3  ;;  %v930_v45 = vadd.f32 %v1615_v1, %v929_v43 }
  0xd4   : > { %v1026_v46 = vadd.f32 %v1615_v1, %v1025_v44  ;;  %v268_v44 = vld [vmem:[%s1482_s20 + $0x2f0] sm:$0xff] }
  0xd5   : > { %1170 = vst.msk [vmem:[%s1624_s25 + $0x240] sm:$0xff] %vm1097_vm2, %v930_v45  ;;  %v300_v45 = vld [vmem:[%s1482_s20 + $0x3f0] sm:$0xff] }
  0xd6   : > { %v740_v49 = vpop.f32.mrf.mxu0  ;;  %1202 = vst.msk [vmem:[%s1624_s25 + $0x340] sm:$0xff] %vm1097_vm2, %v1026_v46 }
  0xd7   : > { %v836_v50 = vpop.f32.mrf.mxu1  ;;  %v741_v53 = vadd.f32 %v1615_v1, %v740_v49  ;;  %1381 = vmatmul.msk.f32.gmra.mxu2 %vm307_vm1, %v263_v47  ;;  %v236_v49 = vld [vmem:[%s1482_s20 + $0x1f0] sm:$0xff] }
  0xd8   : > { %v837_v54 = vadd.f32 %v1615_v1, %v836_v50  ;;  %1413 = vmatmul.msk.f32.gmra.mxu3 %vm307_vm1, %v295_v48  ;;  %v204_v48 = vld [vmem:[%s1482_s20 + $0xf0] sm:$0xff] }
  0xd9   : > { %1107 = vst.msk [vmem:[%s1624_s25 + $0x48] sm:$0xff] %vm1097_vm2, %v741_v53  ;;  %1317 = vmatmul.msk.f32.gmra.mxu0 %vm307_vm1, %v199_v51 }
  0xda   : > { %1349 = vmatmul.msk.f32.gmra.mxu1 %vm307_vm1, %v231_v52  ;;  %1139 = vst.msk [vmem:[%s1624_s25 + $0x148] sm:$0xff] %vm1097_vm2, %v837_v54  ;;  %v932_v55 = vpop.f32.mrf.mxu2 }
  0xdb   : > { %v1028_v56 = vpop.f32.mrf.mxu3  ;;  %v933_v57 = vadd.f32 %v1615_v1, %v932_v55 }
  0xdc   : > { %v1029_v58 = vadd.f32 %v1615_v1, %v1028_v56  ;;  %v269_v56 = vld [vmem:[%s1482_s20 + $0x2f8] sm:$0xff] }
  0xdd   : > { %1171 = vst.msk [vmem:[%s1624_s25 + $0x248] sm:$0xff] %vm1097_vm2, %v933_v57  ;;  %v301_v57 = vld [vmem:[%s1482_s20 + $0x3f8] sm:$0xff] }
  0xde   : > { %v743_v61 = vpop.f32.mrf.mxu0  ;;  %1203 = vst.msk [vmem:[%s1624_s25 + $0x348] sm:$0xff] %vm1097_vm2, %v1029_v58 }
  0xdf   : > { %v839_v62 = vpop.f32.mrf.mxu1  ;;  %v744_v2 = vadd.f32 %v1615_v1, %v743_v61  ;;  %1382 = vmatmul.msk.f32.gmra.mxu2 %vm307_vm1, %v264_v59  ;;  %v237_v61 = vld [vmem:[%s1482_s20 + $0x1f8] sm:$0xff] }
  0xe0   : > { %v840_v3 = vadd.f32 %v1615_v1, %v839_v62  ;;  %1414 = vmatmul.msk.f32.gmra.mxu3 %vm307_vm1, %v296_v60  ;;  %v205_v60 = vld [vmem:[%s1482_s20 + $0xf8] sm:$0xff] }
  0xe1   : > { %1108 = vst.msk [vmem:[%s1624_s25 + $0x50] sm:$0xff] %vm1097_vm2, %v744_v2  ;;  %1318 = vmatmul.msk.f32.gmra.mxu0 %vm307_vm1, %v200_v63 }
  0xe2   : > { %1350 = vmatmul.msk.f32.gmra.mxu1 %vm307_vm1, %v232_v0  ;;  %1140 = vst.msk [vmem:[%s1624_s25 + $0x150] sm:$0xff] %vm1097_vm2, %v840_v3  ;;  %v935_v4 = vpop.f32.mrf.mxu2 }
  0xe3   : > { %v1031_v5 = vpop.f32.mrf.mxu3  ;;  %v936_v6 = vadd.f32 %v1615_v1, %v935_v4 }
  0xe4   : > { %v1032_v7 = vadd.f32 %v1615_v1, %v1031_v5 }
  0xe5   : > { %1172 = vst.msk [vmem:[%s1624_s25 + $0x250] sm:$0xff] %vm1097_vm2, %v936_v6 }
  0xe6   : > { %v746_v10 = vpop.f32.mrf.mxu0  ;;  %1204 = vst.msk [vmem:[%s1624_s25 + $0x350] sm:$0xff] %vm1097_vm2, %v1032_v7 }
  0xe7   : > { %v842_v11 = vpop.f32.mrf.mxu1  ;;  %v747_v14 = vadd.f32 %v1615_v1, %v746_v10  ;;  %1383 = vmatmul.msk.f32.gmra.mxu2 %vm307_vm1, %v265_v8 }
  0xe8   : > { %v843_v15 = vadd.f32 %v1615_v1, %v842_v11  ;;  %1415 = vmatmul.msk.f32.gmra.mxu3 %vm307_vm1, %v297_v9 }
  0xe9   : > { %1109 = vst.msk [vmem:[%s1624_s25 + $0x58] sm:$0xff] %vm1097_vm2, %v747_v14  ;;  %1319 = vmatmul.msk.f32.gmra.mxu0 %vm307_vm1, %v201_v12 }
  0xea   : > { %1351 = vmatmul.msk.f32.gmra.mxu1 %vm307_vm1, %v233_v13  ;;  %1141 = vst.msk [vmem:[%s1624_s25 + $0x158] sm:$0xff] %vm1097_vm2, %v843_v15  ;;  %v938_v16 = vpop.f32.mrf.mxu2 }
  0xeb   : > { %v1034_v17 = vpop.f32.mrf.mxu3  ;;  %v939_v18 = vadd.f32 %v1615_v1, %v938_v16 }
  0xec   : > { %v1035_v19 = vadd.f32 %v1615_v1, %v1034_v17 }
  0xed   : > { %1173 = vst.msk [vmem:[%s1624_s25 + $0x258] sm:$0xff] %vm1097_vm2, %v939_v18 }
  0xee   : > { %v749_v22 = vpop.f32.mrf.mxu0  ;;  %1205 = vst.msk [vmem:[%s1624_s25 + $0x358] sm:$0xff] %vm1097_vm2, %v1035_v19 }
  0xef   : > { %v845_v23 = vpop.f32.mrf.mxu1  ;;  %v750_v26 = vadd.f32 %v1615_v1, %v749_v22  ;;  %1384 = vmatmul.msk.f32.gmra.mxu2 %vm307_vm1, %v266_v20 }
  0xf0   : > { %v846_v27 = vadd.f32 %v1615_v1, %v845_v23  ;;  %1416 = vmatmul.msk.f32.gmra.mxu3 %vm307_vm1, %v298_v21 }
  0xf1   : > { %1110 = vst.msk [vmem:[%s1624_s25 + $0x60] sm:$0xff] %vm1097_vm2, %v750_v26  ;;  %1320 = vmatmul.msk.f32.gmra.mxu0 %vm307_vm1, %v202_v24 }
  0xf2   : > { %1352 = vmatmul.msk.f32.gmra.mxu1 %vm307_vm1, %v234_v25  ;;  %1142 = vst.msk [vmem:[%s1624_s25 + $0x160] sm:$0xff] %vm1097_vm2, %v846_v27  ;;  %v941_v28 = vpop.f32.mrf.mxu2 }
  0xf3   : > { %v1037_v29 = vpop.f32.mrf.mxu3  ;;  %v942_v30 = vadd.f32 %v1615_v1, %v941_v28 }
  0xf4   : > { %v1038_v31 = vadd.f32 %v1615_v1, %v1037_v29 }
  0xf5   : > { %1174 = vst.msk [vmem:[%s1624_s25 + $0x260] sm:$0xff] %vm1097_vm2, %v942_v30 }
  0xf6   : > { %v752_v34 = vpop.f32.mrf.mxu0  ;;  %1206 = vst.msk [vmem:[%s1624_s25 + $0x360] sm:$0xff] %vm1097_vm2, %v1038_v31 }
  0xf7   : > { %v848_v35 = vpop.f32.mrf.mxu1  ;;  %v753_v38 = vadd.f32 %v1615_v1, %v752_v34  ;;  %1385 = vmatmul.msk.f32.gmra.mxu2 %vm307_vm1, %v267_v32 }
  0xf8   : > { %v849_v39 = vadd.f32 %v1615_v1, %v848_v35  ;;  %1417 = vmatmul.msk.f32.gmra.mxu3 %vm307_vm1, %v299_v33 }
  0xf9   : > { %1111 = vst.msk [vmem:[%s1624_s25 + $0x68] sm:$0xff] %vm1097_vm2, %v753_v38  ;;  %1321 = vmatmul.msk.f32.gmra.mxu0 %vm307_vm1, %v203_v36 }
  0xfa   : > { %1353 = vmatmul.msk.f32.gmra.mxu1 %vm307_vm1, %v235_v37  ;;  %1143 = vst.msk [vmem:[%s1624_s25 + $0x168] sm:$0xff] %vm1097_vm2, %v849_v39  ;;  %v944_v40 = vpop.f32.mrf.mxu2 }
  0xfb   : > { %v1040_v41 = vpop.f32.mrf.mxu3  ;;  %v945_v42 = vadd.f32 %v1615_v1, %v944_v40 }
  0xfc   : > { %v1041_v43 = vadd.f32 %v1615_v1, %v1040_v41 }
  0xfd   : > { %1175 = vst.msk [vmem:[%s1624_s25 + $0x268] sm:$0xff] %vm1097_vm2, %v945_v42 }
  0xfe   : > { %v755_v46 = vpop.f32.mrf.mxu0  ;;  %1207 = vst.msk [vmem:[%s1624_s25 + $0x368] sm:$0xff] %vm1097_vm2, %v1041_v43 }
  0xff   : > { %v851_v47 = vpop.f32.mrf.mxu1  ;;  %v756_v50 = vadd.f32 %v1615_v1, %v755_v46  ;;  %1386 = vmatmul.msk.f32.gmra.mxu2 %vm307_vm1, %v268_v44 }
 0x100   : > { %v852_v51 = vadd.f32 %v1615_v1, %v851_v47  ;;  %1418 = vmatmul.msk.f32.gmra.mxu3 %vm307_vm1, %v300_v45 }
 0x101   : > { %1112 = vst.msk [vmem:[%s1624_s25 + $0x70] sm:$0xff] %vm1097_vm2, %v756_v50  ;;  %1322 = vmatmul.msk.f32.gmra.mxu0 %vm307_vm1, %v204_v48 }
 0x102   : > { %1354 = vmatmul.msk.f32.gmra.mxu1 %vm307_vm1, %v236_v49  ;;  %1144 = vst.msk [vmem:[%s1624_s25 + $0x170] sm:$0xff] %vm1097_vm2, %v852_v51  ;;  %v947_v52 = vpop.f32.mrf.mxu2 }
 0x103   : > { %v1043_v53 = vpop.f32.mrf.mxu3  ;;  %v948_v54 = vadd.f32 %v1615_v1, %v947_v52 }
 0x104   : > { %v1044_v55 = vadd.f32 %v1615_v1, %v1043_v53 }
 0x105   : > { %1176 = vst.msk [vmem:[%s1624_s25 + $0x270] sm:$0xff] %vm1097_vm2, %v948_v54 }
 0x106   : > { %v758_v58 = vpop.f32.mrf.mxu0  ;;  %1208 = vst.msk [vmem:[%s1624_s25 + $0x370] sm:$0xff] %vm1097_vm2, %v1044_v55 }
 0x107   : > { %v854_v59 = vpop.f32.mrf.mxu1  ;;  %v759_v62 = vadd.f32 %v1615_v1, %v758_v58  ;;  %1387 = vmatmul.msk.f32.gmra.mxu2 %vm307_vm1, %v269_v56 }
 0x108   : > { %v855_v63 = vadd.f32 %v1615_v1, %v854_v59  ;;  %1419 = vmatmul.msk.f32.gmra.mxu3 %vm307_vm1, %v301_v57 }
 0x109   : > { %1113 = vst.msk [vmem:[%s1624_s25 + $0x78] sm:$0xff] %vm1097_vm2, %v759_v62  ;;  %1323 = vmatmul.msk.f32.gmra.mxu0 %vm307_vm1, %v205_v60 }
 0x10a   : > { %1355 = vmatmul.msk.f32.gmra.mxu1 %vm307_vm1, %v237_v61  ;;  %1145 = vst.msk [vmem:[%s1624_s25 + $0x178] sm:$0xff] %vm1097_vm2, %v855_v63  ;;  %v950_v0 = vpop.f32.mrf.mxu2 }
 0x10b   : > { %v1046_v2 = vpop.f32.mrf.mxu3  ;;  %v951_v3 = vadd.f32 %v1615_v1, %v950_v0 }
 0x10c   : > { %v1047_v4 = vadd.f32 %v1615_v1, %v1046_v2 }
 0x10d   : > { %1177 = vst.msk [vmem:[%s1624_s25 + $0x278] sm:$0xff] %vm1097_vm2, %v951_v3 }
 0x10e   : > { %v761_v5 = vpop.f32.mrf.mxu0  ;;  %1209 = vst.msk [vmem:[%s1624_s25 + $0x378] sm:$0xff] %vm1097_vm2, %v1047_v4 }
 0x10f   : > { %v857_v6 = vpop.f32.mrf.mxu1  ;;  %v762_v7 = vadd.f32 %v1615_v1, %v761_v5 }
 0x110   : > { %v858_v8 = vadd.f32 %v1615_v1, %v857_v6 }
 0x111   : > { %1114 = vst.msk [vmem:[%s1624_s25 + $0x80] sm:$0xff] %vm1097_vm2, %v762_v7 }
 0x112   : > { %1146 = vst.msk [vmem:[%s1624_s25 + $0x180] sm:$0xff] %vm1097_vm2, %v858_v8  ;;  %v953_v9 = vpop.f32.mrf.mxu2 }
 0x113   : > { %v1049_v10 = vpop.f32.mrf.mxu3  ;;  %v954_v11 = vadd.f32 %v1615_v1, %v953_v9 }
 0x114   : > { %v1050_v12 = vadd.f32 %v1615_v1, %v1049_v10 }
 0x115   : > { %1178 = vst.msk [vmem:[%s1624_s25 + $0x280] sm:$0xff] %vm1097_vm2, %v954_v11 }
 0x116   : > { %v764_v13 = vpop.f32.mrf.mxu0  ;;  %1210 = vst.msk [vmem:[%s1624_s25 + $0x380] sm:$0xff] %vm1097_vm2, %v1050_v12 }
 0x117   : > { %v860_v14 = vpop.f32.mrf.mxu1  ;;  %v765_v15 = vadd.f32 %v1615_v1, %v764_v13 }
 0x118   : > { %v861_v16 = vadd.f32 %v1615_v1, %v860_v14 }
 0x119   : > { %1115 = vst.msk [vmem:[%s1624_s25 + $0x88] sm:$0xff] %vm1097_vm2, %v765_v15 }
 0x11a   : > { %1147 = vst.msk [vmem:[%s1624_s25 + $0x188] sm:$0xff] %vm1097_vm2, %v861_v16  ;;  %v956_v17 = vpop.f32.mrf.mxu2 }
 0x11b   : > { %v1052_v18 = vpop.f32.mrf.mxu3  ;;  %v957_v19 = vadd.f32 %v1615_v1, %v956_v17 }
 0x11c   : > { %v1053_v20 = vadd.f32 %v1615_v1, %v1052_v18 }
 0x11d   : > { %1179 = vst.msk [vmem:[%s1624_s25 + $0x288] sm:$0xff] %vm1097_vm2, %v957_v19 }
 0x11e   : > { %v767_v21 = vpop.f32.mrf.mxu0  ;;  %1211 = vst.msk [vmem:[%s1624_s25 + $0x388] sm:$0xff] %vm1097_vm2, %v1053_v20 }
 0x11f   : > { %v863_v22 = vpop.f32.mrf.mxu1  ;;  %v768_v23 = vadd.f32 %v1615_v1, %v767_v21 }
 0x120   : > { %v864_v24 = vadd.f32 %v1615_v1, %v863_v22 }
 0x121   : > { %1116 = vst.msk [vmem:[%s1624_s25 + $0x90] sm:$0xff] %vm1097_vm2, %v768_v23 }
 0x122   : > { %1148 = vst.msk [vmem:[%s1624_s25 + $0x190] sm:$0xff] %vm1097_vm2, %v864_v24  ;;  %v959_v25 = vpop.f32.mrf.mxu2 }
 0x123   : > { %v1055_v26 = vpop.f32.mrf.mxu3  ;;  %v960_v27 = vadd.f32 %v1615_v1, %v959_v25 }
 0x124   : > { %v1056_v28 = vadd.f32 %v1615_v1, %v1055_v26 }
 0x125   : > { %1180 = vst.msk [vmem:[%s1624_s25 + $0x290] sm:$0xff] %vm1097_vm2, %v960_v27 }
 0x126   : > { %v770_v29 = vpop.f32.mrf.mxu0  ;;  %1212 = vst.msk [vmem:[%s1624_s25 + $0x390] sm:$0xff] %vm1097_vm2, %v1056_v28 }
 0x127   : > { %v866_v30 = vpop.f32.mrf.mxu1  ;;  %v771_v31 = vadd.f32 %v1615_v1, %v770_v29 }
 0x128   : > { %v867_v32 = vadd.f32 %v1615_v1, %v866_v30 }
 0x129   : > { %1117 = vst.msk [vmem:[%s1624_s25 + $0x98] sm:$0xff] %vm1097_vm2, %v771_v31 }
 0x12a   : > { %1149 = vst.msk [vmem:[%s1624_s25 + $0x198] sm:$0xff] %vm1097_vm2, %v867_v32  ;;  %v962_v33 = vpop.f32.mrf.mxu2 }
 0x12b   : > { %v1058_v34 = vpop.f32.mrf.mxu3  ;;  %v963_v35 = vadd.f32 %v1615_v1, %v962_v33 }
 0x12c   : > { %v1059_v36 = vadd.f32 %v1615_v1, %v1058_v34 }
 0x12d   : > { %1181 = vst.msk [vmem:[%s1624_s25 + $0x298] sm:$0xff] %vm1097_vm2, %v963_v35 }
 0x12e   : > { %v773_v37 = vpop.f32.mrf.mxu0  ;;  %1213 = vst.msk [vmem:[%s1624_s25 + $0x398] sm:$0xff] %vm1097_vm2, %v1059_v36 }
 0x12f   : > { %v869_v38 = vpop.f32.mrf.mxu1  ;;  %v774_v39 = vadd.f32 %v1615_v1, %v773_v37 }
 0x130   : > { %v870_v40 = vadd.f32 %v1615_v1, %v869_v38 }
 0x131   : > { %1118 = vst.msk [vmem:[%s1624_s25 + $0xa0] sm:$0xff] %vm1097_vm2, %v774_v39 }
 0x132   : > { %1150 = vst.msk [vmem:[%s1624_s25 + $0x1a0] sm:$0xff] %vm1097_vm2, %v870_v40  ;;  %v965_v41 = vpop.f32.mrf.mxu2 }
 0x133   : > { %v1061_v42 = vpop.f32.mrf.mxu3  ;;  %v966_v43 = vadd.f32 %v1615_v1, %v965_v41 }
 0x134   : > { %v1062_v44 = vadd.f32 %v1615_v1, %v1061_v42 }
 0x135   : > { %1182 = vst.msk [vmem:[%s1624_s25 + $0x2a0] sm:$0xff] %vm1097_vm2, %v966_v43 }
 0x136   : > { %v776_v45 = vpop.f32.mrf.mxu0  ;;  %1214 = vst.msk [vmem:[%s1624_s25 + $0x3a0] sm:$0xff] %vm1097_vm2, %v1062_v44 }
 0x137   : > { %v872_v46 = vpop.f32.mrf.mxu1  ;;  %v777_v47 = vadd.f32 %v1615_v1, %v776_v45 }
 0x138   : > { %v873_v48 = vadd.f32 %v1615_v1, %v872_v46 }
 0x139   : > { %1119 = vst.msk [vmem:[%s1624_s25 + $0xa8] sm:$0xff] %vm1097_vm2, %v777_v47 }
 0x13a   : > { %1151 = vst.msk [vmem:[%s1624_s25 + $0x1a8] sm:$0xff] %vm1097_vm2, %v873_v48  ;;  %v968_v49 = vpop.f32.mrf.mxu2 }
 0x13b   : > { %v1064_v50 = vpop.f32.mrf.mxu3  ;;  %v969_v51 = vadd.f32 %v1615_v1, %v968_v49 }
 0x13c   : > { %v1065_v52 = vadd.f32 %v1615_v1, %v1064_v50 }
 0x13d   : > { %1183 = vst.msk [vmem:[%s1624_s25 + $0x2a8] sm:$0xff] %vm1097_vm2, %v969_v51 }
 0x13e   : > { %v779_v53 = vpop.f32.mrf.mxu0  ;;  %1215 = vst.msk [vmem:[%s1624_s25 + $0x3a8] sm:$0xff] %vm1097_vm2, %v1065_v52 }
 0x13f   : > { %v875_v54 = vpop.f32.mrf.mxu1  ;;  %v780_v55 = vadd.f32 %v1615_v1, %v779_v53 }
 0x140   : > { %v876_v56 = vadd.f32 %v1615_v1, %v875_v54 }
 0x141   : > { %1120 = vst.msk [vmem:[%s1624_s25 + $0xb0] sm:$0xff] %vm1097_vm2, %v780_v55 }
 0x142   : > { %1152 = vst.msk [vmem:[%s1624_s25 + $0x1b0] sm:$0xff] %vm1097_vm2, %v876_v56  ;;  %v971_v57 = vpop.f32.mrf.mxu2 }
 0x143   : > { %v1067_v58 = vpop.f32.mrf.mxu3  ;;  %v972_v59 = vadd.f32 %v1615_v1, %v971_v57 }
 0x144   : > { %v1068_v60 = vadd.f32 %v1615_v1, %v1067_v58 }
 0x145   : > { %1184 = vst.msk [vmem:[%s1624_s25 + $0x2b0] sm:$0xff] %vm1097_vm2, %v972_v59 }
 0x146   : > { %v782_v61 = vpop.f32.mrf.mxu0  ;;  %1216 = vst.msk [vmem:[%s1624_s25 + $0x3b0] sm:$0xff] %vm1097_vm2, %v1068_v60 }
 0x147   : > { %v878_v62 = vpop.f32.mrf.mxu1  ;;  %v783_v63 = vadd.f32 %v1615_v1, %v782_v61 }
 0x148   : > { %v879_v0 = vadd.f32 %v1615_v1, %v878_v62 }
 0x149   : > { %1121 = vst.msk [vmem:[%s1624_s25 + $0xb8] sm:$0xff] %vm1097_vm2, %v783_v63 }
 0x14a   : > { %1153 = vst.msk [vmem:[%s1624_s25 + $0x1b8] sm:$0xff] %vm1097_vm2, %v879_v0  ;;  %v974_v2 = vpop.f32.mrf.mxu2 }
 0x14b   : > { %v1070_v3 = vpop.f32.mrf.mxu3  ;;  %v975_v4 = vadd.f32 %v1615_v1, %v974_v2 }
 0x14c   : > { %v1071_v5 = vadd.f32 %v1615_v1, %v1070_v3 }
 0x14d   : > { %1185 = vst.msk [vmem:[%s1624_s25 + $0x2b8] sm:$0xff] %vm1097_vm2, %v975_v4 }
 0x14e   : > { %v785_v6 = vpop.f32.mrf.mxu0  ;;  %1217 = vst.msk [vmem:[%s1624_s25 + $0x3b8] sm:$0xff] %vm1097_vm2, %v1071_v5 }
 0x14f   : > { %v881_v7 = vpop.f32.mrf.mxu1  ;;  %v786_v8 = vadd.f32 %v1615_v1, %v785_v6  ;;  %v1434_v6 = vld [vmem:[%s2143_s2] ss:$0 sm:$0xff] }
 0x150   : > { %v882_v9 = vadd.f32 %v1615_v1, %v881_v7 }
 0x151   : > { %1122 = vst.msk [vmem:[%s1624_s25 + $0xc0] sm:$0xff] %vm1097_vm2, %v786_v8 }
 0x152   : > { %1154 = vst.msk [vmem:[%s1624_s25 + $0x1c0] sm:$0xff] %vm1097_vm2, %v882_v9  ;;  %v977_v10 = vpop.f32.mrf.mxu2 }
 0x153   : > { %v1073_v11 = vpop.f32.mrf.mxu3  ;;  %v978_v12 = vadd.f32 %v1615_v1, %v977_v10 }
 0x154   : > { %v1074_v13 = vadd.f32 %v1615_v1, %v1073_v11 }
 0x155   : > { %1186 = vst.msk [vmem:[%s1624_s25 + $0x2c0] sm:$0xff] %vm1097_vm2, %v978_v12 }
 0x156   : > { %v788_v14 = vpop.f32.mrf.mxu0  ;;  %1218 = vst.msk [vmem:[%s1624_s25 + $0x3c0] sm:$0xff] %vm1097_vm2, %v1074_v13 }
 0x157   : > { %v884_v15 = vpop.f32.mrf.mxu1  ;;  %v789_v16 = vadd.f32 %v1615_v1, %v788_v14 }
 0x158   : > { %v885_v17 = vadd.f32 %v1615_v1, %v884_v15 }
 0x159   : > { %1123 = vst.msk [vmem:[%s1624_s25 + $0xc8] sm:$0xff] %vm1097_vm2, %v789_v16 }
 0x15a   : > { %1155 = vst.msk [vmem:[%s1624_s25 + $0x1c8] sm:$0xff] %vm1097_vm2, %v885_v17  ;;  %v980_v18 = vpop.f32.mrf.mxu2 }
 0x15b   : > { %v1076_v19 = vpop.f32.mrf.mxu3  ;;  %v981_v20 = vadd.f32 %v1615_v1, %v980_v18 }
 0x15c   : > { %v1077_v21 = vadd.f32 %v1615_v1, %v1076_v19 }
 0x15d   : > { %1187 = vst.msk [vmem:[%s1624_s25 + $0x2c8] sm:$0xff] %vm1097_vm2, %v981_v20 }
 0x15e   : > { %v791_v22 = vpop.f32.mrf.mxu0  ;;  %1219 = vst.msk [vmem:[%s1624_s25 + $0x3c8] sm:$0xff] %vm1097_vm2, %v1077_v21 }
 0x15f   : > { %v887_v23 = vpop.f32.mrf.mxu1  ;;  %v792_v24 = vadd.f32 %v1615_v1, %v791_v22 }
 0x160   : > { %v888_v25 = vadd.f32 %v1615_v1, %v887_v23 }
 0x161   : > { %1124 = vst.msk [vmem:[%s1624_s25 + $0xd0] sm:$0xff] %vm1097_vm2, %v792_v24 }
 0x162   : > { %1156 = vst.msk [vmem:[%s1624_s25 + $0x1d0] sm:$0xff] %vm1097_vm2, %v888_v25  ;;  %v983_v26 = vpop.f32.mrf.mxu2 }
 0x163   : > { %v1079_v27 = vpop.f32.mrf.mxu3  ;;  %v984_v28 = vadd.f32 %v1615_v1, %v983_v26 }
 0x164   : > { %v1080_v29 = vadd.f32 %v1615_v1, %v1079_v27 }
 0x165   : > { %1188 = vst.msk [vmem:[%s1624_s25 + $0x2d0] sm:$0xff] %vm1097_vm2, %v984_v28 }
 0x166   : > { %v794_v30 = vpop.f32.mrf.mxu0  ;;  %1220 = vst.msk [vmem:[%s1624_s25 + $0x3d0] sm:$0xff] %vm1097_vm2, %v1080_v29 }
 0x167   : > { %v890_v31 = vpop.f32.mrf.mxu1  ;;  %v795_v32 = vadd.f32 %v1615_v1, %v794_v30 }
 0x168   : > { %v891_v33 = vadd.f32 %v1615_v1, %v890_v31 }
 0x169   : > { %1125 = vst.msk [vmem:[%s1624_s25 + $0xd8] sm:$0xff] %vm1097_vm2, %v795_v32 }
 0x16a   : > { %1157 = vst.msk [vmem:[%s1624_s25 + $0x1d8] sm:$0xff] %vm1097_vm2, %v891_v33  ;;  %v986_v34 = vpop.f32.mrf.mxu2 }
 0x16b   : > { %v1082_v35 = vpop.f32.mrf.mxu3  ;;  %v987_v36 = vadd.f32 %v1615_v1, %v986_v34 }
 0x16c   : > { %v1083_v37 = vadd.f32 %v1615_v1, %v1082_v35 }
 0x16d   : > { %1189 = vst.msk [vmem:[%s1624_s25 + $0x2d8] sm:$0xff] %vm1097_vm2, %v987_v36 }
 0x16e   : > { %v797_v38 = vpop.f32.mrf.mxu0  ;;  %1221 = vst.msk [vmem:[%s1624_s25 + $0x3d8] sm:$0xff] %vm1097_vm2, %v1083_v37 }
 0x16f   : > { %v893_v39 = vpop.f32.mrf.mxu1  ;;  %v798_v40 = vadd.f32 %v1615_v1, %v797_v38 }
 0x170   : > { %v894_v41 = vadd.f32 %v1615_v1, %v893_v39 }
 0x171   : > { %1126 = vst.msk [vmem:[%s1624_s25 + $0xe0] sm:$0xff] %vm1097_vm2, %v798_v40 }
 0x172   : > { %1158 = vst.msk [vmem:[%s1624_s25 + $0x1e0] sm:$0xff] %vm1097_vm2, %v894_v41  ;;  %v989_v42 = vpop.f32.mrf.mxu2 }
 0x173   : > { %v1085_v43 = vpop.f32.mrf.mxu3  ;;  %v990_v44 = vadd.f32 %v1615_v1, %v989_v42 }
 0x174   : > { %v1086_v45 = vadd.f32 %v1615_v1, %v1085_v43 }
 0x175   : > { %1190 = vst.msk [vmem:[%s1624_s25 + $0x2e0] sm:$0xff] %vm1097_vm2, %v990_v44 }
 0x176   : > { %v800_v46 = vpop.f32.mrf.mxu0  ;;  %1222 = vst.msk [vmem:[%s1624_s25 + $0x3e0] sm:$0xff] %vm1097_vm2, %v1086_v45 }
 0x177   : > { %v896_v47 = vpop.f32.mrf.mxu1  ;;  %v801_v48 = vadd.f32 %v1615_v1, %v800_v46 }
 0x178   : > { %v897_v49 = vadd.f32 %v1615_v1, %v896_v47 }
 0x179   : > { %1127 = vst.msk [vmem:[%s1624_s25 + $0xe8] sm:$0xff] %vm1097_vm2, %v801_v48 }
 0x17a   : > { %1159 = vst.msk [vmem:[%s1624_s25 + $0x1e8] sm:$0xff] %vm1097_vm2, %v897_v49  ;;  %v992_v50 = vpop.f32.mrf.mxu2 }
 0x17b   : > { %v1088_v51 = vpop.f32.mrf.mxu3  ;;  %v993_v52 = vadd.f32 %v1615_v1, %v992_v50 }
 0x17c   : > { %v1089_v53 = vadd.f32 %v1615_v1, %v1088_v51 }
 0x17d   : > { %1191 = vst.msk [vmem:[%s1624_s25 + $0x2e8] sm:$0xff] %vm1097_vm2, %v993_v52 }
 0x17e   : > { %v803_v54 = vpop.f32.mrf.mxu0  ;;  %1223 = vst.msk [vmem:[%s1624_s25 + $0x3e8] sm:$0xff] %vm1097_vm2, %v1089_v53 }
 0x17f   : > { %v899_v55 = vpop.f32.mrf.mxu1  ;;  %v804_v56 = vadd.f32 %v1615_v1, %v803_v54 }
 0x180   : > { %v900_v57 = vadd.f32 %v1615_v1, %v899_v55 }
 0x181   : > { %1128 = vst.msk [vmem:[%s1624_s25 + $0xf0] sm:$0xff] %vm1097_vm2, %v804_v56 }
 0x182   : > { %1160 = vst.msk [vmem:[%s1624_s25 + $0x1f0] sm:$0xff] %vm1097_vm2, %v900_v57  ;;  %v995_v58 = vpop.f32.mrf.mxu2 }
 0x183   : > { %v1091_v59 = vpop.f32.mrf.mxu3  ;;  %v996_v60 = vadd.f32 %v1615_v1, %v995_v58 }
 0x184   : > { %v1092_v61 = vadd.f32 %v1615_v1, %v1091_v59 }
 0x185   : > { %1192 = vst.msk [vmem:[%s1624_s25 + $0x2f0] sm:$0xff] %vm1097_vm2, %v996_v60 }
 0x186   : > { %v806_v62 = vpop.f32.mrf.mxu0  ;;  %1224 = vst.msk [vmem:[%s1624_s25 + $0x3f0] sm:$0xff] %vm1097_vm2, %v1092_v61 }
 0x187   : > { %v902_v63 = vpop.f32.mrf.mxu1  ;;  %v807_v0 = vadd.f32 %v1615_v1, %v806_v62 }
 0x188   : > { %v903_v2 = vadd.f32 %v1615_v1, %v902_v63 }
 0x189   : > { %1129 = vst.msk [vmem:[%s1624_s25 + $0xf8] sm:$0xff] %vm1097_vm2, %v807_v0 }
 0x18a   : > { %1161 = vst.msk [vmem:[%s1624_s25 + $0x1f8] sm:$0xff] %vm1097_vm2, %v903_v2  ;;  %v998_v3 = vpop.f32.mrf.mxu2 }
 0x18b   : > { %v1094_v4 = vpop.f32.mrf.mxu3  ;;  %v999_v5 = vadd.f32 %v1615_v1, %v998_v3 }
 0x18c   : > { %v1095_v7 = vadd.f32 %v1434_v6, %v1094_v4 }
 0x18d   : > { %1193 = vst.msk [vmem:[%s1624_s25 + $0x2f8] sm:$0xff] %vm1097_vm2, %v999_v5 }
 0x18e   : > { %1225 = vst.msk [vmem:[%s1624_s25 + $0x3f8] sm:$0xff] %vm1097_vm2, %v1095_v7 }
 0x18f PF: > { %s13_s12 = sadd.s32 1, %s1441_s12  }
 0x190   : > { %p10_p4 = scmp.ge.s32.totalorder %s13_s12, 4  }
 0x192   :  { %12 = sbr.rel (!%p10_p4) target bundleno = 1 (0x1), region = 62 }

</bundles_post_ra>
